<compile_context>
chip_gen: v7x
topology: tpu7x:2x2x1
jax: 0.10.0
libtpu: 0.0.40
codegen_flags: <defaults>
</compile_context>

<pallas_src>
import functools
import math

import jax
import jax.numpy as jnp
from jax.experimental import pallas as pl
from jax.experimental.pallas import tpu as pltpu


def _label_smoothing_loss_kernel(
    tgt_ref, c_ref, x_ref, w_ref, b_ref, loss_ref,
    m_sc, s_sc, ltgt_sc,
    *, confidence, smoothing_value, pad_index, h_const, vocab_tile):
    """One grid step: a (row_tile, vocab_tile) logits tile of the generator."""
    k = pl.program_id(1)
    nk = pl.num_programs(1)

    @pl.when(k == 0)
    def _init():
        m_sc[...] = jnp.full_like(m_sc, -jnp.inf)
        s_sc[...] = jnp.zeros_like(s_sc)
        ltgt_sc[...] = jnp.zeros_like(ltgt_sc)

    # ---- generator: logits tile = x @ W^T + b  (bf16 MXU, f32 accumulate) ----
    logits = jnp.dot(x_ref[...], w_ref[...], preferred_element_type=jnp.float32)
    logits = logits + b_ref[...]                                         # (TM, TV) f32

    tm, tv = logits.shape
    # tile-offset hoisted onto the (TM,1) target side (cheap), iota stays a plain
    # lane pattern -> no full-tile add per step.
    tgt_rel = tgt_ref[...] - k * vocab_tile                              # (TM, 1) int32
    col = jax.lax.broadcasted_iota(jnp.int32, (tm, tv), 1)

    # ---- online softmax statistics over vocab tiles ----
    m_new = jnp.maximum(m_sc[...], jnp.max(logits, axis=-1, keepdims=True))
    s_sc[...] = (jnp.exp(m_sc[...] - m_new) * s_sc[...]
                 + jnp.sum(jnp.exp(logits - m_new), axis=-1, keepdims=True))
    m_sc[...] = m_new

    # logit at the target column (exactly one hit across all vocab tiles per row)
    ltgt_sc[...] = ltgt_sc[...] + jnp.sum(
        jnp.where(col == tgt_rel, logits, 0.0), axis=-1, keepdims=True)

    @pl.when(k == nk - 1)
    def _finalize():
        lse = m_sc[...] + jnp.log(s_sc[...])                             # (TM, 1)
        # cross = conf*logp[tgt] + sv*(sum_j logp[j] - logp[pad] - logp[tgt])
        #       = (conf - sv)*logit[tgt] + sv*(lsum - lpad) - lse
        # with sv*(lsum - lpad) precomputed exactly in f32 in the wrapper (c_ref).
        cross = (confidence - smoothing_value) * ltgt_sc[...] + c_ref[...] - lse
        loss_rows = h_const - cross
        # rows whose target is the pad index contribute nothing (masked_fill in torch)
        loss_ref[...] = jnp.where(tgt_ref[...] == pad_index, 0.0,
                                  loss_rows).astype(loss_ref.dtype)


def _round_up(x, m):
    return ((x + m - 1) // m) * m


def label_smoothing_loss(outputs, targets, weight, bias, *,
                         label_smoothing, pad_index=0,
                         row_tile=512, vocab_tile=512,
                         compute_dtype=jnp.bfloat16,
                         weight_t=None,
                         vmem_limit_bytes=None):
    """Returns (loss, count) matching LabelSmoothingLoss.forward.

    weight: (V, D) generator weight (nn.Linear);  bias: (V,)
    weight_t: optional pre-transposed/pre-cast (D, V) weight in `compute_dtype`
              (pass it to avoid an extra full-weight HBM pass per call).
    """
    assert 0.0 < label_smoothing <= 1.0
    B, S, D = outputs.shape
    V = weight.shape[0]
    assert V > 2, "smoothing_value = label_smoothing / (V - 2) requires V > 2"

    confidence = 1.0 - label_smoothing
    smoothing_value = label_smoothing / (V - 2)
    # entropy of the smoothed target distribution of a non-pad row (Python constant)
    h_const = ((confidence * math.log(confidence) if confidence > 0.0 else 0.0)
               + (V - 2) * smoothing_value * math.log(smoothing_value))

    n_rows = B * S

    # ---- row tiling: multiple of 16 (bf16 packing); >=2 tiles when possible (megacore) ----
    if n_rows <= row_tile:
        if n_rows > 16:
            row_tile = _round_up(pl.cdiv(n_rows, 2), 16)
        else:
            row_tile = _round_up(max(n_rows, 1), 16)
    else:
        row_tile = _round_up(row_tile, 16)
    padded_rows = _round_up(n_rows, row_tile)

    # ---- vocab tiling: pad V up to a multiple of the tile (never full-V fallback) ----
    vocab_tile = max(128, min(_round_up(vocab_tile, 128), _round_up(V, 128)))
    v_pad = _round_up(V, vocab_tile)

    # ---- wrapper-side exact f32 side term: c = sv * (sum_j logit_j - logit_pad) ----
    x_f32 = outputs.reshape(n_rows, D).astype(jnp.float32)
    w_f32 = weight.astype(jnp.float32)
    b_f32 = bias.astype(jnp.float32)
    w_side = jnp.sum(w_f32, axis=0) - w_f32[pad_index]                   # (D,)
    b_side = jnp.sum(b_f32) - b_f32[pad_index]                           # ()
    c_row = smoothing_value * (x_f32 @ w_side + b_side)                  # (n_rows,) f32

    # ---- assemble padded kernel inputs ----
    x = outputs.reshape(n_rows, D)
    tgt = targets.reshape(n_rows).astype(jnp.int32)
    if padded_rows != n_rows:
        pad_r = padded_rows - n_rows
        # padded rows use target == pad_index, so they add 0 loss and 0 count
        x = jnp.pad(x, ((0, pad_r), (0, 0)))
        tgt = jnp.pad(tgt, (0, pad_r), constant_values=pad_index)
        c_row = jnp.pad(c_row, (0, pad_r))
    x = x.astype(compute_dtype)
    tgt = tgt.reshape(padded_rows, 1)
    c_row = c_row.reshape(padded_rows, 1).astype(jnp.float32)

    if weight_t is None:
        w_t = jnp.transpose(weight).astype(compute_dtype)                # (D, V)
    else:
        assert weight_t.shape == (D, V)
        w_t = weight_t.astype(compute_dtype)
    # pad vocab tail: zero weight columns + very negative bias => exp() == 0 exactly
    w_t = jnp.pad(w_t, ((0, 0), (0, v_pad - V)))
    b_pad = jnp.pad(b_f32, (0, v_pad - V), constant_values=-1e30).reshape(1, v_pad)

    grid = (padded_rows // row_tile, v_pad // vocab_tile)

    # ---- VMEM budget: raise the scoped limit if the tiles need it, capped by HW ----
    if vmem_limit_bytes is None:
        est = (2 * D * vocab_tile * 2          # W^T tile (bf16), double buffered
               + 2 * row_tile * D * 2          # x tile (bf16), double buffered
               + 2 * vocab_tile * 4 * 2        # bias tile (f32), double buffered
               + row_tile * vocab_tile * 4     # f32 logits temporary
               + 8 * row_tile * 128 * 4)       # (TM,1) blocks/scratch, lane padded
        est = int(est * 1.6)
        if est > (16 << 20):
            cap = 96 << 20
            try:
                cap = int(pltpu.get_tpu_info().vmem_capacity_bytes * 0.85)
            except Exception:
                pass
            vmem_limit_bytes = min(est, cap)
    extra_cp = {"vmem_limit_bytes": vmem_limit_bytes} if vmem_limit_bytes else {}

    kernel = functools.partial(
        _label_smoothing_loss_kernel,
        confidence=confidence, smoothing_value=smoothing_value,
        pad_index=pad_index, h_const=h_const, vocab_tile=vocab_tile)

    per_row_loss = pl.pallas_call(
        kernel,
        out_shape=jax.ShapeDtypeStruct((padded_rows, 1), jnp.float32),
        grid_spec=pltpu.PrefetchScalarGridSpec(
            num_scalar_prefetch=0,
            grid=grid,
            in_specs=[
                pl.BlockSpec((row_tile, 1), lambda i, k: (i, 0)),        # targets
                pl.BlockSpec((row_tile, 1), lambda i, k: (i, 0)),        # sv*(lsum-lpad)
                pl.BlockSpec((row_tile, D), lambda i, k: (i, 0)),        # activations (bf16)
                pl.BlockSpec((D, vocab_tile), lambda i, k: (0, k)),      # generator W^T tile
                pl.BlockSpec((1, vocab_tile), lambda i, k: (0, k)),      # generator bias tile
            ],
            out_specs=pl.BlockSpec((row_tile, 1), lambda i, k: (i, 0)),  # per-row loss
            scratch_shapes=[pltpu.VMEM((row_tile, 1), jnp.float32)] * 3,
        ),
        compiler_params=pltpu.CompilerParams(
            dimension_semantics=("parallel", "arbitrary"), **extra_cp),
    )(tgt, c_row, x, w_t, b_pad)

    loss = jnp.sum(per_row_loss)
    # count matches `(targets != pad).sum().item()` (returned as a device scalar)
    count = jnp.sum(targets != pad_index).astype(jnp.int32)
    return loss, count


def _reference(outputs, targets, weight, bias, label_smoothing, pad_index=0):
    """Plain-JAX (float32) reference mirroring the PyTorch module."""
    B, S, D = outputs.shape
    V = weight.shape[0]
    logits = outputs.reshape(-1, D) @ weight.T + bias
    logp = jax.nn.log_softmax(logits, axis=-1)
    tgt = targets.reshape(-1)
    conf = 1.0 - label_smoothing
    sv = label_smoothing / (V - 2)
    t = jnp.full((tgt.shape[0], V), sv, dtype=jnp.float32)
    t = t.at[:, pad_index].set(0.0)
    t = t.at[jnp.arange(tgt.shape[0]), tgt].set(conf)
    t = jnp.where((tgt == pad_index)[:, None], 0.0, t)
    kl = jnp.where(t > 0, t * (jnp.log(jnp.where(t > 0, t, 1.0)) - logp), 0.0)
    return jnp.sum(kl), jnp.sum(targets != pad_index)


if __name__ == "__main__":
    B, S, D_MODEL, VOCAB = 2, 8, 32, 128
    LABEL_SMOOTHING = 0.1
    PAD_INDEX = 0

    key = jax.random.PRNGKey(0)
    k_out, k_w, k_b, k_tgt = jax.random.split(key, 4)

    outputs = jax.random.normal(k_out, (B, S, D_MODEL), dtype=jnp.float32)
    # Deterministic generator (nn.Linear(d_model, vocab)) parameters.
    weight = 0.1 * jax.random.normal(k_w, (VOCAB, D_MODEL), dtype=jnp.float32)
    bias = 0.01 * jax.random.normal(k_b, (VOCAB,), dtype=jnp.float32)

    targets = jax.random.randint(k_tgt, (B, S), 1, VOCAB, dtype=jnp.int32)
    targets = targets.at[0, 0].set(PAD_INDEX)   # include some pad positions
    targets = targets.at[1, 3].set(PAD_INDEX)

    loss, count = label_smoothing_loss(
        outputs, targets, weight, bias,
        label_smoothing=LABEL_SMOOTHING, pad_index=PAD_INDEX)
    jax.block_until_ready((loss, count))

    ref_loss, ref_count = _reference(outputs, targets, weight, bias,
                                     LABEL_SMOOTHING, PAD_INDEX)
    assert int(count) == int(ref_count), (int(count), int(ref_count))
    # bf16 MXU inputs (f32 accumulation) => relative tolerance vs the f32 reference.
    tol = 1e-2 * abs(float(ref_loss)) + 5e-2
    assert abs(float(loss) - float(ref_loss)) < tol, (float(loss), float(ref_loss))

    print("KERNEL_OK")
</pallas_src>

<mosaic_0001>
module attributes {stable_mosaic.version = 11 : i64} {
  func.func @_label_smoothing_loss_kernel(%arg0: i32, %arg1: i32, %arg2: memref<16x1xi32, #tpu.memory_space<vmem>>, %arg3: memref<16x1xf32, #tpu.memory_space<vmem>>, %arg4: memref<16x32xbf16, #tpu.memory_space<vmem>>, %arg5: memref<32x128xbf16, #tpu.memory_space<vmem>>, %arg6: memref<1x128xf32, #tpu.memory_space<vmem>>, %arg7: memref<16x1xf32, #tpu.memory_space<vmem>>, %arg8: memref<16x1xf32, #tpu.memory_space<vmem>>, %arg9: memref<16x1xf32, #tpu.memory_space<vmem>>, %arg10: memref<16x1xf32, #tpu.memory_space<vmem>>) attributes {dimension_semantics = [#tpu.dimension_semantics<parallel>, #tpu.dimension_semantics<arbitrary>], iteration_bounds = array<i64: 1, 1>, scalar_prefetch = 0 : i64, scratch_operands = 3 : i64, tpu.core_type = #tpu.core_type<tc>, window_params = [{transform_indices = @transform_0, window_bounds = array<i64: 16, 1>}, {transform_indices = @transform_1, window_bounds = array<i64: 16, 1>}, {transform_indices = @transform_2, window_bounds = array<i64: 16, 32>}, {transform_indices = @transform_3, window_bounds = array<i64: 32, 128>}, {transform_indices = @transform_4, window_bounds = array<i64: 1, 128>}, {transform_indices = @transform_5, window_bounds = array<i64: 16, 1>}]} {
    %c0_i32 = arith.constant 0 : i32
    %0 = arith.cmpi eq, %arg1, %c0_i32 : i32
    %1 = arith.extui %0 : i1 to i32
    %c0_i32_0 = arith.constant 0 : i32
    %2 = arith.cmpi ne, %1, %c0_i32_0 : i32
    scf.if %2 {
      %cst_28 = arith.constant 0xFF800000 : f32
      %43 = vector.broadcast %cst_28 : f32 to vector<16x1xf32>
      %c0_29 = arith.constant 0 : index
      %c0_30 = arith.constant 0 : index
      %44 = vector.load %arg8[%c0_29, %c0_30] : memref<16x1xf32, #tpu.memory_space<vmem>>, vector<16x1xf32>
      tpu.vector_store %arg8[%c0_29, %c0_30], %43 {strides = array<i32>} : memref<16x1xf32, #tpu.memory_space<vmem>>, vector<16x1xf32>,
      %cst_31 = arith.constant 0.000000e+00 : f32
      %45 = vector.broadcast %cst_31 : f32 to vector<16x1xf32>
      %c0_32 = arith.constant 0 : index
      %c0_33 = arith.constant 0 : index
      %46 = vector.load %arg9[%c0_32, %c0_33] : memref<16x1xf32, #tpu.memory_space<vmem>>, vector<16x1xf32>
      tpu.vector_store %arg9[%c0_32, %c0_33], %45 {strides = array<i32>} : memref<16x1xf32, #tpu.memory_space<vmem>>, vector<16x1xf32>,
      %cst_34 = arith.constant 0.000000e+00 : f32
      %47 = vector.broadcast %cst_34 : f32 to vector<16x1xf32>
      %c0_35 = arith.constant 0 : index
      %c0_36 = arith.constant 0 : index
      %48 = vector.load %arg10[%c0_35, %c0_36] : memref<16x1xf32, #tpu.memory_space<vmem>>, vector<16x1xf32>
      tpu.vector_store %arg10[%c0_35, %c0_36], %47 {strides = array<i32>} : memref<16x1xf32, #tpu.memory_space<vmem>>, vector<16x1xf32>,
    } else {
    }
    %c0 = arith.constant 0 : index
    %c0_1 = arith.constant 0 : index
    %3 = vector.load %arg4[%c0, %c0_1] : memref<16x32xbf16, #tpu.memory_space<vmem>>, vector<16x32xbf16>
    %c0_2 = arith.constant 0 : index
    %c0_3 = arith.constant 0 : index
    %4 = vector.load %arg5[%c0_2, %c0_3] : memref<32x128xbf16, #tpu.memory_space<vmem>>, vector<32x128xbf16>
    %cst = arith.constant dense<0.000000e+00> : vector<16x128xf32>
    %5 = tpu.matmul %3, %4, %cst {dimension_numbers = #tpu.dot_dimension_numbers<[1], [0], [0], [1], [0, 0, 1, 1], [], []>} : vector<16x32xbf16>, vector<32x128xbf16>, vector<16x128xf32> -> vector<16x128xf32>
    %c0_4 = arith.constant 0 : index
    %c0_5 = arith.constant 0 : index
    %6 = vector.load %arg6[%c0_4, %c0_5] : memref<1x128xf32, #tpu.memory_space<vmem>>, vector<1x128xf32>
    %7 = vector.broadcast %6 : vector<1x128xf32> to vector<16x128xf32>
    %8 = arith.addf %5, %7 : vector<16x128xf32>
    %c0_6 = arith.constant 0 : index
    %c0_7 = arith.constant 0 : index
    %9 = vector.load %arg2[%c0_6, %c0_7] : memref<16x1xi32, #tpu.memory_space<vmem>>, vector<16x1xi32>
    %c128_i32 = arith.constant 128 : i32
    %10 = arith.muli %arg1, %c128_i32 : i32
    %11 = vector.broadcast %10 : i32 to vector<16x1xi32>
    %12 = arith.subi %9, %11 : vector<16x1xi32>
    %13 = tpu.iota {dimensions = array<i32: 1>} : vector<16x128xi32>
    %c0_8 = arith.constant 0 : index
    %c0_9 = arith.constant 0 : index
    %14 = vector.load %arg8[%c0_8, %c0_9] : memref<16x1xf32, #tpu.memory_space<vmem>>, vector<16x1xf32>
    %cst_10 = arith.constant dense<0xFF800000> : vector<16xf32>
    %15 = vector.multi_reduction <maximumf>, %8, %cst_10 [1] : vector<16x128xf32> to vector<16xf32>
    %16 = vector.shape_cast %15 : vector<16xf32> to vector<16x1xf32>
    %17 = arith.maximumf %14, %16 : vector<16x1xf32>
    %c0_11 = arith.constant 0 : index
    %c0_12 = arith.constant 0 : index
    %18 = vector.load %arg8[%c0_11, %c0_12] : memref<16x1xf32, #tpu.memory_space<vmem>>, vector<16x1xf32>
    %19 = arith.subf %18, %17 : vector<16x1xf32>
    %20 = math.exp %19 : vector<16x1xf32>
    %c0_13 = arith.constant 0 : index
    %c0_14 = arith.constant 0 : index
    %21 = vector.load %arg9[%c0_13, %c0_14] : memref<16x1xf32, #tpu.memory_space<vmem>>, vector<16x1xf32>
    %22 = arith.mulf %20, %21 : vector<16x1xf32>
    %23 = vector.broadcast %17 : vector<16x1xf32> to vector<16x128xf32>
    %24 = arith.subf %8, %23 : vector<16x128xf32>
    %25 = math.exp %24 : vector<16x128xf32>
    %cst_15 = arith.constant dense<0.000000e+00> : vector<16xf32>
    %26 = vector.multi_reduction <add>, %25, %cst_15 [1] : vector<16x128xf32> to vector<16xf32>
    %27 = vector.shape_cast %26 : vector<16xf32> to vector<16x1xf32>
    %28 = arith.addf %22, %27 : vector<16x1xf32>
    %c0_16 = arith.constant 0 : index
    %c0_17 = arith.constant 0 : index
    %29 = vector.load %arg9[%c0_16, %c0_17] : memref<16x1xf32, #tpu.memory_space<vmem>>, vector<16x1xf32>
    tpu.vector_store %arg9[%c0_16, %c0_17], %28 {strides = array<i32>} : memref<16x1xf32, #tpu.memory_space<vmem>>, vector<16x1xf32>,
    %c0_18 = arith.constant 0 : index
    %c0_19 = arith.constant 0 : index
    %30 = vector.load %arg8[%c0_18, %c0_19] : memref<16x1xf32, #tpu.memory_space<vmem>>, vector<16x1xf32>
    tpu.vector_store %arg8[%c0_18, %c0_19], %17 {strides = array<i32>} : memref<16x1xf32, #tpu.memory_space<vmem>>, vector<16x1xf32>,
    %c0_20 = arith.constant 0 : index
    %c0_21 = arith.constant 0 : index
    %31 = vector.load %arg10[%c0_20, %c0_21] : memref<16x1xf32, #tpu.memory_space<vmem>>, vector<16x1xf32>
    %32 = vector.broadcast %12 : vector<16x1xi32> to vector<16x128xi32>
    %33 = arith.cmpi eq, %13, %32 : vector<16x128xi32>
    %cst_22 = arith.constant 0.000000e+00 : f32
    %34 = vector.broadcast %cst_22 : f32 to vector<16x128xf32>
    %35 = arith.select %33, %8, %34 : vector<16x128xi1>, vector<16x128xf32>
    %cst_23 = arith.constant dense<0.000000e+00> : vector<16xf32>
    %36 = vector.multi_reduction <add>, %35, %cst_23 [1] : vector<16x128xf32> to vector<16xf32>
    %37 = vector.shape_cast %36 : vector<16xf32> to vector<16x1xf32>
    %38 = arith.addf %31, %37 : vector<16x1xf32>
    %c0_24 = arith.constant 0 : index
    %c0_25 = arith.constant 0 : index
    %39 = vector.load %arg10[%c0_24, %c0_25] : memref<16x1xf32, #tpu.memory_space<vmem>>, vector<16x1xf32>
    tpu.vector_store %arg10[%c0_24, %c0_25], %38 {strides = array<i32>} : memref<16x1xf32, #tpu.memory_space<vmem>>, vector<16x1xf32>,
    %c0_i32_26 = arith.constant 0 : i32
    %40 = arith.cmpi eq, %arg1, %c0_i32_26 : i32
    %41 = arith.extui %40 : i1 to i32
    %c0_i32_27 = arith.constant 0 : i32
    %42 = arith.cmpi ne, %41, %c0_i32_27 : i32
    scf.if %42 {
      %c0_28 = arith.constant 0 : index
      %c0_29 = arith.constant 0 : index
      %43 = vector.load %arg8[%c0_28, %c0_29] : memref<16x1xf32, #tpu.memory_space<vmem>>, vector<16x1xf32>
      %c0_30 = arith.constant 0 : index
      %c0_31 = arith.constant 0 : index
      %44 = vector.load %arg9[%c0_30, %c0_31] : memref<16x1xf32, #tpu.memory_space<vmem>>, vector<16x1xf32>
      %45 = math.log %44 : vector<16x1xf32>
      %46 = arith.addf %43, %45 : vector<16x1xf32>
      %c0_32 = arith.constant 0 : index
      %c0_33 = arith.constant 0 : index
      %47 = vector.load %arg10[%c0_32, %c0_33] : memref<16x1xf32, #tpu.memory_space<vmem>>, vector<16x1xf32>
      %cst_34 = arith.constant 0.89920634 : f32
      %48 = vector.broadcast %cst_34 : f32 to vector<16x1xf32>
      %49 = arith.mulf %48, %47 : vector<16x1xf32>
      %c0_35 = arith.constant 0 : index
      %c0_36 = arith.constant 0 : index
      %50 = vector.load %arg3[%c0_35, %c0_36] : memref<16x1xf32, #tpu.memory_space<vmem>>, vector<16x1xf32>
      %51 = arith.addf %49, %50 : vector<16x1xf32>
      %52 = arith.subf %51, %46 : vector<16x1xf32>
      %cst_37 = arith.constant -0.808711171 : f32
      %53 = vector.broadcast %cst_37 : f32 to vector<16x1xf32>
      %54 = arith.subf %53, %52 : vector<16x1xf32>
      %c0_38 = arith.constant 0 : index
      %c0_39 = arith.constant 0 : index
      %55 = vector.load %arg2[%c0_38, %c0_39] : memref<16x1xi32, #tpu.memory_space<vmem>>, vector<16x1xi32>
      %c0_i32_40 = arith.constant 0 : i32
      %56 = vector.broadcast %c0_i32_40 : i32 to vector<16x1xi32>
      %57 = arith.cmpi eq, %55, %56 : vector<16x1xi32>
      %cst_41 = arith.constant 0.000000e+00 : f32
      %58 = vector.broadcast %cst_41 : f32 to vector<16x1xf32>
      %59 = arith.select %57, %58, %54 : vector<16x1xi1>, vector<16x1xf32>
      %c0_42 = arith.constant 0 : index
      %c0_43 = arith.constant 0 : index
      %60 = vector.load %arg7[%c0_42, %c0_43] : memref<16x1xf32, #tpu.memory_space<vmem>>, vector<16x1xf32>
      tpu.vector_store %arg7[%c0_42, %c0_43], %59 {strides = array<i32>} : memref<16x1xf32, #tpu.memory_space<vmem>>, vector<16x1xf32>,
    } else {
    }
    return
  }
  func.func @transform_0(%arg0: i32, %arg1: i32) -> (i32, i32) {
    %c0_i32 = arith.constant 0 : i32
    %c0_i32_0 = arith.constant 0 : i32
    return %arg0, %c0_i32 : i32, i32
  }
  func.func @transform_1(%arg0: i32, %arg1: i32) -> (i32, i32) {
    %c0_i32 = arith.constant 0 : i32
    %c0_i32_0 = arith.constant 0 : i32
    return %arg0, %c0_i32 : i32, i32
  }
  func.func @transform_2(%arg0: i32, %arg1: i32) -> (i32, i32) {
    %c0_i32 = arith.constant 0 : i32
    %c0_i32_0 = arith.constant 0 : i32
    return %arg0, %c0_i32 : i32, i32
  }
  func.func @transform_3(%arg0: i32, %arg1: i32) -> (i32, i32) {
    %c0_i32 = arith.constant 0 : i32
    %c0_i32_0 = arith.constant 0 : i32
    return %c0_i32, %arg1 : i32, i32
  }
  func.func @transform_4(%arg0: i32, %arg1: i32) -> (i32, i32) {
    %c0_i32 = arith.constant 0 : i32
    %c0_i32_0 = arith.constant 0 : i32
    return %c0_i32, %arg1 : i32, i32
  }
  func.func @transform_5(%arg0: i32, %arg1: i32) -> (i32, i32) {
    %c0_i32 = arith.constant 0 : i32
    %c0_i32_0 = arith.constant 0 : i32
    return %arg0, %c0_i32 : i32, i32
  }
}

</mosaic_0001>

<bundles_post_ra>
// kernel: tpu_custom_call.1
= control target key start
LH: loop header
LB: loop body
LE: loop exit
PB: predicated region body
PF: predicated region fallthrough
CT: control target
= control target key end

     0   :  { %v254_v0 = vmov 0.0   ;;  %vm255_vm0 = vmmov 0   ;;  %vm62_vm1 = vcmask 261120   ;;  %v256_v4 = vmov 0   ;;  %s340_s3 = inlined_call_operand.vmem [shape: bf16[32,128], index: 3, kind: input, shape index: {}]   ;;  %s341_s2 = inlined_call_operand.vmem [shape: bf16[16,32], index: 2, kind: input, shape index: {}]   ;;  %s342_s4 = inlined_call_operand.vmem [shape: f32[1,128], index: 4, kind: input, shape index: {}]   ;;  %s343_s0 = inlined_call_operand.vmem [shape: s32[16,1], index: 0, kind: input, shape index: {}]   ;;  %s344_s1 = inlined_call_operand.vmem [shape: f32[16,1], index: 1, kind: input, shape index: {}]   ;;  %s345_s5 = inlined_call_operand.vmem [shape: f32[16,1], index: 5, kind: output, shape index: {}]  }
   0x1   :  { %225 = vmatprep.subr.bf16.mxu0 %v254_v0  ;;  %v239_v1 = vld [vmem:[%s340_s3] sm:$0xff]   ;;  %229 = vmatprep.mubr.msk.bf16.mxu0 %vm255_vm0, %v254_v0  ;;  %v240_v2 = vld [vmem:[%s340_s3 + $0x8] sm:$0xff]   ;;  %vm25_vm2 = vcmask 7168   ;;  %v257_v5 = vmov -inf   ;;  %v113_v21 = vlaneseq }
   0x2   :  { %226 = vmatpush3.bf16.msra.mxu0 %v239_v1  ;;  %v241_v3 = vld [vmem:[%s341_s2] sm:$0xff]   ;;  %238 = vset.pattern.permute.xlu0 %v256_v4  ;;  %26 = vst.msk [vmem:[#allocation2] sm:$0xff] %vm25_vm2, %v257_v5  ;;  %27 = vst.msk [vmem:[#allocation2 + $0x8] sm:$0xff] %vm25_vm2, %v257_v5  ;;  %v317_v23 = vld [vmem:[%s343_s0 + $0x8] sm:$0xff] }
   0x3   :  { %227 = vmatprep.subr.bf16.mxu0 %v254_v0  ;;  %237 = vset.pattern.permute.xlu1 %v256_v4  ;;  %28 = vst.msk [vmem:[#allocation3] sm:$0xff] %vm25_vm2, %v254_v0  ;;  %29 = vst.msk [vmem:[#allocation3 + $0x8] sm:$0xff] %vm25_vm2, %v254_v0  ;;  %v217_v6 = vld [vmem:[%s342_s4] ss:$0 sm:$0xff]  ;;  %v114_v24 = vand.u32 127, %v113_v21  ;;  %v198_v4 = vld [vmem:[%s344_s1 + $0x8] sm:$0xff] }
   0x4   :  { %30 = vst.msk [vmem:[#allocation4] sm:$0xff] %vm25_vm2, %v254_v0  ;;  %31 = vst.msk [vmem:[#allocation4 + $0x8] sm:$0xff] %vm25_vm2, %v254_v0  ;;  %v309_v13 = vld [vmem:[%s343_s0] sm:$0xff]  ;;  %vm208_vm6 = vcmp.eq.s32.totalorder %v317_v23, 0 }
   0x5   :  { %v197_v60 = vld [vmem:[%s344_s1] sm:$0xff]  ;;  %vm207_vm5 = vcmp.eq.s32.totalorder %v309_v13, 0 }
   0x6   :  { %228 = vmatpush3.bf16.msra.mxu0 %v240_v2 }
   0x9   :  { %230 = vmatmul.mubr.msk.bf16.vlgmr.msra.gmra.mrb[0].mxu0 %vm62_vm1, %v241_v3  ;;  %v115_v14 = vld [vmem:[#allocation2] sm:$0xff]  ;;  %v116_v17 = vld [vmem:[#allocation2 + $0x8] sm:$0xff] }
   0xa   :  { %v129_v43 = vld [vmem:[#allocation3] sm:$0xff]  ;;  %v130_v47 = vld [vmem:[#allocation3 + $0x8] sm:$0xff] }
   0xb   :  { %v160_v37 = vld [vmem:[#allocation4] sm:$0xff]  ;;  %v161_v52 = vld [vmem:[#allocation4 + $0x8] sm:$0xff] }
  0xdc   :  { %v100_v7 = vpop.f32.mrb[0].mxu0 }
  0xdd   :  { %v101_v8 = vadd.f32 %v217_v6, %v100_v7  ;;  %v231_v9 = vpop.f32.mrb[1].mxu0 }
  0xde   :  { %v103_v10 = vpop.f32.mrb[2].mxu0 }
  0xdf   :  { %117 = vmax.xlane.f32.xlu0 %v101_v8  ;;  %v232_v11 = vpop.f32.mrb[3].mxu0  ;;  %v104_v12 = vadd.f32 %v217_v6, %v103_v10 }
  0xe3   :  { %119 = vmax.xlane.f32.xlu0 %v104_v12 }
  0xf9   :  { %163 = vperm.xlu0 %238, %v309_v13  }
 0x16c   :  { %v118_v15 = vpop.xlane.xlu0 %117 }
 0x16d   :  { %v121_v16 = vmax.f32 %v115_v14, %v118_v15 }
 0x16f   :  { %v123_v18 = vsub.f32 %v115_v14, %v121_v16  ;;  %158 = vst.msk [vmem:[#allocation2] sm:$0xff] %vm25_vm2, %v121_v16  ;;  %135 = vperm.xlu1 %237, %v121_v16  }
 0x170   :  { %v120_v19 = vpop.xlane.xlu0 %119 }
 0x171   :  { %v122_v20 = vmax.f32 %v116_v17, %v120_v19  ;;  %v125_v40 = vmul.f32 1.442695, %v123_v18 }
 0x173   :  { %v124_v22 = vsub.f32 %v116_v17, %v122_v20  ;;  %159 = vst.msk [vmem:[#allocation2 + $0x8] sm:$0xff] %vm25_vm2, %v122_v20  ;;  %140 = vperm.xlu1 %237, %v122_v20  }
 0x175   :  { %v127_v41 = vmul.f32 1.442695, %v124_v22 }
 0x176   :  { %v183_v63 = vld [vmem:[#allocation2] sm:$0xff] }
 0x177   :  { %166 = vperm.xlu1 %237, %v317_v23  }
 0x178   :  { %v164_v25 = vpop.permute.xlu0 %163 }
 0x179   :  { %vm168_vm3 = vcmp.eq.s32.totalorder %v114_v24, %v164_v25 }
 0x17a   :  { %v170_v26 = vsel %vm168_vm3, %v101_v8, 0.0  ;;  %v184_v7 = vld [vmem:[#allocation2 + $0x8] sm:$0xff] }
 0x17b   :  { %172 = vadd.xlane.f32.xlu0 %v170_v26 }
 0x1ee   :  { %v136_v27 = vpop.permute.xlu1 %135 }
 0x1ef   :  { %v143_v28 = vsub.f32 %v101_v8, %v136_v27 }
 0x1f1   :  { %v145_v29 = vmul.f32 1.442695, %v143_v28 }
 0x1f2   :  { %v141_v30 = vpop.permute.xlu1 %140 }
 0x1f3   :  { %242 = vpow2.f32 %v145_v29  ;;  %v144_v31 = vsub.f32 %v104_v12, %v141_v30 }
 0x1f5   :  { %v147_v32 = vmul.f32 1.442695, %v144_v31 }
 0x1f6   :  { %v167_v34 = vpop.permute.xlu1 %166 }
 0x1f7   :  { %244 = vpow2.f32 %v147_v32  ;;  %vm169_vm4 = vcmp.eq.s32.totalorder %v114_v24, %v167_v34 }
 0x1f8   :  { %v171_v36 = vsel %vm169_vm4, %v104_v12, 0.0  ;;  %246 = vpow2.f32 %v125_v40 }
 0x1f9   :  { %248 = vpow2.f32 %v127_v41 }
 0x1fd   :  { %v243_v33 = vpop.eup %242 }
 0x1fe   :  { %149 = vadd.xlane.f32.xlu1 %v243_v33 }
 0x201   :  { %v245_v35 = vpop.eup %244 }
 0x202   :  { %151 = vadd.xlane.f32.xlu1 %v245_v35  ;;  %v247_v42 = vpop.eup %246 }
 0x203   :  { %v131_v44 = vmul.f32 %v247_v42, %v129_v43  ;;  %v249_v45 = vpop.eup %248 }
 0x204   :  { %v132_v49 = vmul.f32 %v249_v45, %v130_v47 }
 0x206   :  { %174 = vadd.xlane.f32.xlu1 %v171_v36 }
 0x208   :  { %v173_v38 = vpop.xlane.xlu0 %172 }
 0x209   :  { %v176_v39 = vadd.f32 %v173_v38, %v160_v37 }
 0x20b   :  { %178 = vst.msk [vmem:[#allocation4] sm:$0xff] %vm25_vm2, %v176_v39 }
 0x212   :  { %v193_v57 = vld [vmem:[#allocation4] sm:$0xff] }
 0x213   :  { %v195_v58 = vmul.f32 0.89920634, %v193_v57 }
 0x215   :  { %v199_v0 = vadd.f32 %v197_v60, %v195_v58 }
 0x28b   :  { %v150_v46 = vpop.xlane.xlu1 %149 }
 0x28c   :  { %v153_v48 = vadd.f32 %v150_v46, %v131_v44 }
 0x28e   :  { %156 = vst.msk [vmem:[#allocation3] sm:$0xff] %vm25_vm2, %v153_v48 }
 0x28f   :  { %v152_v50 = vpop.xlane.xlu1 %151 }
 0x290   :  { %v154_v51 = vadd.f32 %v152_v50, %v132_v49 }
 0x292   :  { %157 = vst.msk [vmem:[#allocation3 + $0x8] sm:$0xff] %vm25_vm2, %v154_v51 }
 0x293   :  { %v175_v53 = vpop.xlane.xlu1 %174 }
 0x294   :  { %v177_v54 = vadd.f32 %v175_v53, %v161_v52 }
 0x295   :  { %v185_v55 = vld [vmem:[#allocation3] sm:$0xff] }
 0x296   :  { %250 = vlog2.f32 %v185_v55  ;;  %179 = vst.msk [vmem:[#allocation4 + $0x8] sm:$0xff] %vm25_vm2, %v177_v54 }
 0x299   :  { %v186_v56 = vld [vmem:[#allocation3 + $0x8] sm:$0xff] }
 0x29a   :  { %252 = vlog2.f32 %v186_v56 }
 0x29d   :  { %v194_v61 = vld [vmem:[#allocation4 + $0x8] sm:$0xff] }
 0x29e   :  { %v196_v2 = vmul.f32 0.89920634, %v194_v61 }
 0x2a0   :  { %v251_v59 = vpop.eup %250  ;;  %v200_v10 = vadd.f32 %v198_v4, %v196_v2 }
 0x2a1   :  { %v188_v62 = vmul.f32 0.6931472, %v251_v59 }
 0x2a3   :  { %v191_v1 = vadd.f32 %v188_v62, %v183_v63 }
 0x2a4   :  { %v253_v3 = vpop.eup %252 }
 0x2a5   :  { %v201_v5 = vsub.f32 %v199_v0, %v191_v1  ;;  %v190_v6 = vmul.f32 0.6931472, %v253_v3 }
 0x2a7   :  { %v203_v8 = vsub.f32 -0.8087112, %v201_v5  ;;  %v192_v9 = vadd.f32 %v190_v6, %v184_v7 }
 0x2a9   :  { %v209_v11 = vsel %vm207_vm5, 0.0, %v203_v8  ;;  %v202_v12 = vsub.f32 %v200_v10, %v192_v9 }
 0x2aa   :  { %211 = vst.msk [vmem:[%s345_s5] sm:$0xff] %vm25_vm2, %v209_v11 }
 0x2ab   :  { %v204_v14 = vsub.f32 -0.8087112, %v202_v12 }
 0x2ad   :  { %v210_v15 = vsel %vm208_vm6, 0.0, %v204_v14 }
 0x2ae   :  { %212 = vst.msk [vmem:[%s345_s5 + $0x8] sm:$0xff] %vm25_vm2, %v210_v15 }

</bundles_post_ra>
